<compile_context>
chip_gen: v5e
topology: v5e:2x2
jax: 0.10.0
libtpu: 0.0.40
codegen_flags: <defaults>
</compile_context>

<pallas_src>
import functools

import jax
import jax.numpy as jnp
from jax import lax
from jax.experimental import pallas as pl
from jax.experimental.pallas import tpu as pltpu


def _round_up(x, m):
    return ((x + m - 1) // m) * m


def _vmem_budget_bytes():
    """~75% of physical VMEM; conservative 48 MiB fallback if the query fails."""
    try:
        info = pltpu.get_tpu_info()
        cap = int(getattr(info, "vmem_capacity_bytes", 64 * 2**20))
    except Exception:
        cap = 64 * 2**20
    return max(16 * 2**20, (cap * 3) // 4)


# ---------------------------------------------------------------------------
# Kernel 1 (grid over edge tiles, "arbitrary"): per-edge scores + edge-feature
# norms, plus the online softmax statistics (running max, running sum-of-exp)
# accumulated into resident (1,1) outputs.
# ---------------------------------------------------------------------------
def edge_score_kernel(x_src_ref, x_dst_ref, w_ref, v_ref,
                      scores_ref, feat_ref, m_ref, l_ref, *, num_edges):
    e = pl.program_id(0)
    te = scores_ref.shape[0]

    x_src = x_src_ref[...]                           # [TE, Fp] f32
    x_dst = x_dst_ref[...]                           # [TE, Fp]

    # edge_features = ||x_src - x_dst||_2 along the feature dim -> [TE, 1]
    diff = x_src - x_dst
    feat_ref[...] = jnp.sqrt(jnp.sum(diff * diff, axis=1, keepdims=True))

    # Reassociated score:  scores = (a @ (x_src + x_dst)) @ W^T.  v = a @ (x_src + x_dst)
    # is a tiny [1, Fp] vector computed once in the wrapper, so per tile this is just a
    # broadcast multiply + lane reduction (see NOTE in the header re: MXU N=1 padding).
    scores = jnp.sum(w_ref[...] * v_ref[...], axis=1, keepdims=True)   # [TE, 1]
    scores = jnp.where(scores > 0, scores, 0.2 * scores)               # LeakyReLU(0.2)

    # Mask padded edges out of the softmax (their exp underflows to exactly 0).
    edge_ids = e * te + lax.broadcasted_iota(jnp.int32, scores.shape, 0)
    scores = jnp.where(edge_ids < num_edges, scores, -1e30)
    scores_ref[...] = scores

    # Online softmax statistics (P3 accumulator pattern on resident (1,1) outputs).
    tile_max = jnp.max(scores, axis=0, keepdims=True)                  # [1, 1]

    @pl.when(e == 0)
    def _init():
        m_ref[...] = tile_max
        l_ref[...] = jnp.sum(jnp.exp(scores - tile_max), axis=0, keepdims=True)

    @pl.when(e > 0)
    def _update():
        m_old = m_ref[...]
        m_new = jnp.maximum(m_old, tile_max)
        l_ref[...] = (l_ref[...] * jnp.exp(m_old - m_new)
                      + jnp.sum(jnp.exp(scores - m_new), axis=0, keepdims=True))
        m_ref[...] = m_new


# ---------------------------------------------------------------------------
# Kernel 2 (grid over edge tiles, "parallel"): finalize the softmax and write
# the per-edge message rows ONCE, in bf16:  msg[e, :] = weight[e]*feat[e]*x_dst[e, :].
# ---------------------------------------------------------------------------
def edge_msg_kernel(scores_ref, feat_ref, x_dst_ref, m_ref, l_ref, msg_ref):
    inv_l = pl.reciprocal(l_ref[...], approx=True)                     # EUP slot, ~free
    coef = jnp.exp(scores_ref[...] - m_ref[...]) * inv_l * feat_ref[...]   # [TE, 1] f32
    msg_ref[...] = (coef * x_dst_ref[...]).astype(msg_ref.dtype)           # [TE, Fp] bf16


# ---------------------------------------------------------------------------
# Kernel 3 (grid = node tiles [parallel] x edge tiles [arbitrary]): one-hot
# scatter-add as a bf16 MXU matmul with an f32 VMEM accumulator.
#   out[n, :] = sum_e [src[e] == n] * msg[e, :]
# ---------------------------------------------------------------------------
def scatter_kernel(msg_ref, src_ref, out_ref, acc_ref, rowid_ref):
    i = pl.program_id(0)
    k = pl.program_id(1)
    tn = acc_ref.shape[0]

    @pl.when(k == 0)
    def _init():
        acc_ref[...] = jnp.zeros_like(acc_ref)
        # Node ids of this output tile; cached across the whole edge (reduction) axis.
        rowid_ref[...] = i * tn + lax.broadcasted_iota(jnp.int32, rowid_ref.shape, 0)

    # one-hot[n, e] built directly in bf16 (0/1 is exact) -> native bf16 MXU pass.
    onehot = (rowid_ref[...] == src_ref[...]).astype(jnp.bfloat16)     # [TN, TE]
    acc_ref[...] += jnp.dot(onehot, msg_ref[...],
                            preferred_element_type=jnp.float32)

    @pl.when(k == pl.num_programs(1) - 1)
    def _finalize():
        out_ref[...] = acc_ref[...].astype(out_ref.dtype)


# ---------------------------------------------------------------------------
# Wrapper
# ---------------------------------------------------------------------------
def mesh_cnn_layer(x, edge_index, W, a, *, node_tile=1024, edge_tile=1024):
    """x: [N, F] float, edge_index: [2, E] int, W: [OUT, F], a: [OUT]. Requires OUT == E."""
    N, F = x.shape
    OUT, Fin = W.shape
    E = edge_index.shape[1]
    assert Fin == F
    # torch: `a @ (W(x[src]) + W(x[dst]))` only type-checks when out_features == num_edges.
    assert OUT == E, "out_features must equal the number of edges (torch matmul constraint)"

    vmem_budget = _vmem_budget_bytes()

    # ---- padded / tiled sizes -----------------------------------------------------------
    Fp = _round_up(F, 128)                                   # lane-dense feature dim
    TE = _round_up(min(edge_tile, _round_up(E, 128)), 128)   # 128-aligned edge tiles
    TN = _round_up(min(node_tile, _round_up(N, 8)), 8)       # 8-aligned node tiles
    # v7x megacore: keep at least 2 node tiles on the parallel axis when N is large.
    while TN > 256 and (N + TN - 1) // TN < 2:
        TN = _round_up(TN // 2, 8)

    def scatter_step_bytes(tn, te):
        return (2 * (te * Fp * 2 + te * 4)      # double-buffered bf16 msg + src row
                + tn * Fp * 4                   # f32 accumulator scratch
                + 2 * tn * Fp * 4               # output tile (+ writeback buffer)
                + tn * 4)                       # node-id scratch

    # Shrink tiles until the scatter's per-step working set fits comfortably.
    while scatter_step_bytes(TN, TE) > vmem_budget // 2 and (TE > 128 or TN > 8):
        if TE > 128 and TE >= TN:
            TE = _round_up(TE // 2, 128)
        elif TN > 8:
            TN = _round_up(TN // 2, 8)
        else:
            break

    Ep = _round_up(E, TE)
    Np = _round_up(N, TN)
    n_edge_tiles = Ep // TE
    n_node_tiles = Np // TN

    # ---- wrapper-side prep: one padded copy of x, gather straight into padded layout ----
    src = edge_index[0].astype(jnp.int32)
    dst = edge_index[1].astype(jnp.int32)

    x_pad = jnp.zeros((N + 1, Fp), jnp.float32).at[:N, :F].set(x.astype(jnp.float32))
    pad_idx = jnp.full((Ep - E,), N, dtype=jnp.int32)        # padded edges -> zero row
    src_g = jnp.concatenate([src, pad_idx])
    dst_g = jnp.concatenate([dst, pad_idx])
    # TODO(synk): for large graphs gather these rows inside the kernels via manual DMA
    # (scalar-prefetched indices) instead of materializing [Ep, Fp] copies in HBM.
    x_src_p = x_pad[src_g]                                   # [Ep, Fp]
    x_dst_p = x_pad[dst_g]                                   # [Ep, Fp]

    w_p = jnp.zeros((Ep, Fp), jnp.float32).at[:OUT, :F].set(W.astype(jnp.float32))
    a_p = jnp.zeros((Ep,), jnp.float32).at[:OUT].set(a.astype(jnp.float32))

    # v = a @ (x[src] + x[dst]) : tiny [Fp] matvec done once (reassociated score math).
    v = (a_p @ x_src_p + a_p @ x_dst_p).reshape(1, Fp)

    # Padded edges must never match a real node in the scatter.
    src_row = jnp.pad(src.reshape(1, E), ((0, 0), (0, Ep - E)), constant_values=-1)

    # ---- kernel 1: scores + edge-feature norms + online softmax stats -------------------
    scores, feat, m_stat, l_stat = pl.pallas_call(
        functools.partial(edge_score_kernel, num_edges=E),
        out_shape=(jax.ShapeDtypeStruct((Ep, 1), jnp.float32),
                   jax.ShapeDtypeStruct((Ep, 1), jnp.float32),
                   jax.ShapeDtypeStruct((1, 1), jnp.float32),
                   jax.ShapeDtypeStruct((1, 1), jnp.float32)),
        grid_spec=pltpu.PrefetchScalarGridSpec(
            num_scalar_prefetch=0,
            grid=(n_edge_tiles,),
            in_specs=[
                pl.BlockSpec((TE, Fp), lambda e: (e, 0)),    # x[src] rows
                pl.BlockSpec((TE, Fp), lambda e: (e, 0)),    # x[dst] rows
                pl.BlockSpec((TE, Fp), lambda e: (e, 0)),    # W rows (OUT == E)
                pl.BlockSpec((1, Fp), lambda e: (0, 0)),     # v = a @ (x_src + x_dst)
            ],
            out_specs=[
                pl.BlockSpec((TE, 1), lambda e: (e, 0)),     # scores
                pl.BlockSpec((TE, 1), lambda e: (e, 0)),     # edge feature norms
                pl.BlockSpec((1, 1), lambda e: (0, 0)),      # running max   (resident)
                pl.BlockSpec((1, 1), lambda e: (0, 0)),      # running sumexp(resident)
            ],
        ),
        compiler_params=pltpu.CompilerParams(
            dimension_semantics=("arbitrary",),              # online-softmax reduction
            vmem_limit_bytes=int(vmem_budget)),
        cost_estimate=pl.CostEstimate(
            flops=6 * Ep * Fp, transcendentals=3 * Ep,
            bytes_accessed=4 * (3 * Ep * Fp + Fp + 2 * Ep + 2)),
    )(x_src_p, x_dst_p, w_p, v)

    # ---- kernel 2: precomputed bf16 message rows ----------------------------------------
    msg = pl.pallas_call(
        edge_msg_kernel,
        out_shape=jax.ShapeDtypeStruct((Ep, Fp), jnp.bfloat16),
        grid_spec=pltpu.PrefetchScalarGridSpec(
            num_scalar_prefetch=0,
            grid=(n_edge_tiles,),
            in_specs=[
                pl.BlockSpec((TE, 1), lambda e: (e, 0)),     # scores
                pl.BlockSpec((TE, 1), lambda e: (e, 0)),     # edge feature norms
                pl.BlockSpec((TE, Fp), lambda e: (e, 0)),    # x[dst] rows
                pl.BlockSpec((1, 1), lambda e: (0, 0)),      # softmax max
                pl.BlockSpec((1, 1), lambda e: (0, 0)),      # softmax sum-of-exp
            ],
            out_specs=pl.BlockSpec((TE, Fp), lambda e: (e, 0)),
        ),
        compiler_params=pltpu.CompilerParams(
            dimension_semantics=("parallel",),
            vmem_limit_bytes=int(vmem_budget)),
        cost_estimate=pl.CostEstimate(
            flops=4 * Ep * Fp, transcendentals=Ep,
            bytes_accessed=4 * Ep * Fp + 2 * Ep * Fp + 4 * (2 * Ep + 2)),
    )(scores, feat, x_dst_p, m_stat, l_stat)

    # ---- kernel 3: tiled one-hot scatter-add (bf16 MXU, f32 accumulator) ----------------
    out_p = pl.pallas_call(
        scatter_kernel,
        out_shape=jax.ShapeDtypeStruct((Np, Fp), jnp.float32),
        grid_spec=pltpu.PrefetchScalarGridSpec(
            num_scalar_prefetch=0,
            grid=(n_node_tiles, n_edge_tiles),
            in_specs=[
                pl.BlockSpec((TE, Fp), lambda i, k: (k, 0)),   # bf16 msg rows
                pl.BlockSpec((1, TE), lambda i, k: (0, k)),    # src node ids
            ],
            out_specs=pl.BlockSpec((TN, Fp), lambda i, k: (i, 0)),
            scratch_shapes=[pltpu.VMEM((TN, Fp), jnp.float32),   # f32 accumulator
                            pltpu.VMEM((TN, 1), jnp.int32)],     # cached node ids
        ),
        compiler_params=pltpu.CompilerParams(
            dimension_semantics=("parallel", "arbitrary"),
            vmem_limit_bytes=int(vmem_budget)),
        cost_estimate=pl.CostEstimate(
            flops=2 * Np * Ep * Fp + Np * Ep,
            transcendentals=0,
            # msg / src are re-streamed once per node tile; output written once.
            bytes_accessed=n_node_tiles * (2 * Ep * Fp + 4 * Ep) + 4 * Np * Fp),
    )(msg, src_row)
    # TODO(synk): for very large N*E replace the dense one-hot matmul with a true
    # segment-sum (edges bucketed by src, per-node offsets via scalar prefetch).

    return out_p[:N, :F].astype(x.dtype)


# ---------------------------------------------------------------------------
# Pure-JAX reference (mirrors the PyTorch module) for a sanity check.
# ---------------------------------------------------------------------------
def mesh_cnn_reference(x, edge_index, W, a):
    src, dst = edge_index[0], edge_index[1]
    x_src, x_dst = x[src], x[dst]
    edge_feat = jnp.linalg.norm(x_src - x_dst, axis=1)
    m = x_src @ W.T + x_dst @ W.T
    scores = a @ m
    scores = jnp.where(scores > 0, scores, 0.2 * scores)
    weights = jax.nn.softmax(scores, axis=0)
    msg = (weights * edge_feat)[:, None] * x_dst
    return jnp.zeros_like(x).at[src].add(msg)


if __name__ == "__main__":
    key = jax.random.PRNGKey(0)
    k1, k2, k3, k4 = jax.random.split(key, 4)

    N, F = 8, 16          # nodes, in_features
    E = 8                 # edges
    OUT = E               # out_features (torch's `a @ ...` requires OUT == E)

    x = jax.random.normal(k1, (N, F), dtype=jnp.float32)
    edge_index = jax.random.randint(k2, (2, E), 0, N, dtype=jnp.int32)
    W = jax.random.normal(k3, (OUT, F), dtype=jnp.float32) * (1.0 / jnp.sqrt(F))
    a = jax.random.normal(k4, (OUT,), dtype=jnp.float32)

    out = mesh_cnn_layer(x, edge_index, W, a)
    jax.block_until_ready(out)
    assert out.shape == (N, F)

    ref = mesh_cnn_reference(x, edge_index, W, a)
    # bf16 message rows + approx reciprocal => allow ~2^-8 relative error.
    assert jnp.allclose(out, ref, rtol=2e-2, atol=2e-2), (
        f"max abs err {jnp.max(jnp.abs(out - ref))}")
    print("KERNEL_OK")
</pallas_src>

<mosaic_0001>
module attributes {stable_mosaic.version = 11 : i64} {
  func.func @edge_score_kernel(%arg0: i32, %arg1: memref<128x128xf32, #tpu.memory_space<vmem>>, %arg2: memref<128x128xf32, #tpu.memory_space<vmem>>, %arg3: memref<128x128xf32, #tpu.memory_space<vmem>>, %arg4: memref<1x128xf32, #tpu.memory_space<vmem>>, %arg5: memref<128x1xf32, #tpu.memory_space<vmem>>, %arg6: memref<128x1xf32, #tpu.memory_space<vmem>>, %arg7: memref<1x1xf32, #tpu.memory_space<vmem>>, %arg8: memref<1x1xf32, #tpu.memory_space<vmem>>) attributes {dimension_semantics = [#tpu.dimension_semantics<arbitrary>], iteration_bounds = array<i64: 1>, scalar_prefetch = 0 : i64, scratch_operands = 0 : i64, tpu.core_type = #tpu.core_type<tc>, window_params = [{transform_indices = @transform_0, window_bounds = array<i64: 128, 128>}, {transform_indices = @transform_1, window_bounds = array<i64: 128, 128>}, {transform_indices = @transform_2, window_bounds = array<i64: 128, 128>}, {pipeline_mode = #tpu.pipeline_mode<synchronous>, transform_indices = @transform_3, window_bounds = array<i64: 1, 128>}, {transform_indices = @transform_4, window_bounds = array<i64: 128, 1>}, {transform_indices = @transform_5, window_bounds = array<i64: 128, 1>}, {pipeline_mode = #tpu.pipeline_mode<synchronous>, transform_indices = @transform_6, window_bounds = array<i64: 1, 1>}, {pipeline_mode = #tpu.pipeline_mode<synchronous>, transform_indices = @transform_7, window_bounds = array<i64: 1, 1>}]} {
    %c0 = arith.constant 0 : index
    %c0_0 = arith.constant 0 : index
    %0 = vector.load %arg1[%c0, %c0_0] : memref<128x128xf32, #tpu.memory_space<vmem>>, vector<128x128xf32>
    %c0_1 = arith.constant 0 : index
    %c0_2 = arith.constant 0 : index
    %1 = vector.load %arg2[%c0_1, %c0_2] : memref<128x128xf32, #tpu.memory_space<vmem>>, vector<128x128xf32>
    %2 = arith.subf %0, %1 : vector<128x128xf32>
    %3 = arith.mulf %2, %2 : vector<128x128xf32>
    %cst = arith.constant dense<0.000000e+00> : vector<128xf32>
    %4 = vector.multi_reduction <add>, %3, %cst [1] : vector<128x128xf32> to vector<128xf32>
    %5 = vector.shape_cast %4 : vector<128xf32> to vector<128x1xf32>
    %6 = math.sqrt %5 : vector<128x1xf32>
    %c0_3 = arith.constant 0 : index
    %c0_4 = arith.constant 0 : index
    %7 = vector.load %arg6[%c0_3, %c0_4] : memref<128x1xf32, #tpu.memory_space<vmem>>, vector<128x1xf32>
    tpu.vector_store %arg6[%c0_3, %c0_4], %6 {strides = array<i32>} : memref<128x1xf32, #tpu.memory_space<vmem>>, vector<128x1xf32>,
    %c0_5 = arith.constant 0 : index
    %c0_6 = arith.constant 0 : index
    %8 = vector.load %arg3[%c0_5, %c0_6] : memref<128x128xf32, #tpu.memory_space<vmem>>, vector<128x128xf32>
    %c0_7 = arith.constant 0 : index
    %c0_8 = arith.constant 0 : index
    %9 = vector.load %arg4[%c0_7, %c0_8] : memref<1x128xf32, #tpu.memory_space<vmem>>, vector<1x128xf32>
    %10 = vector.broadcast %9 : vector<1x128xf32> to vector<128x128xf32>
    %11 = arith.mulf %8, %10 : vector<128x128xf32>
    %cst_9 = arith.constant dense<0.000000e+00> : vector<128xf32>
    %12 = vector.multi_reduction <add>, %11, %cst_9 [1] : vector<128x128xf32> to vector<128xf32>
    %13 = vector.shape_cast %12 : vector<128xf32> to vector<128x1xf32>
    %cst_10 = arith.constant 0.000000e+00 : f32
    %14 = vector.broadcast %cst_10 : f32 to vector<128x1xf32>
    %15 = arith.cmpf ogt, %13, %14 : vector<128x1xf32>
    %cst_11 = arith.constant 2.000000e-01 : f32
    %16 = vector.broadcast %cst_11 : f32 to vector<128x1xf32>
    %17 = arith.mulf %16, %13 : vector<128x1xf32>
    %18 = arith.select %15, %13, %17 : vector<128x1xi1>, vector<128x1xf32>
    %c128_i32 = arith.constant 128 : i32
    %19 = arith.muli %arg0, %c128_i32 : i32
    %20 = tpu.iota {dimensions = array<i32: 0>} : vector<128x1xi32>
    %21 = vector.broadcast %19 : i32 to vector<128x1xi32>
    %22 = arith.addi %21, %20 : vector<128x1xi32>
    %c8_i32 = arith.constant 8 : i32
    %23 = vector.broadcast %c8_i32 : i32 to vector<128x1xi32>
    %24 = arith.cmpi slt, %22, %23 : vector<128x1xi32>
    %cst_12 = arith.constant -1.000000e+30 : f32
    %25 = vector.broadcast %cst_12 : f32 to vector<128x1xf32>
    %26 = arith.select %24, %18, %25 : vector<128x1xi1>, vector<128x1xf32>
    %c0_13 = arith.constant 0 : index
    %c0_14 = arith.constant 0 : index
    %27 = vector.load %arg5[%c0_13, %c0_14] : memref<128x1xf32, #tpu.memory_space<vmem>>, vector<128x1xf32>
    tpu.vector_store %arg5[%c0_13, %c0_14], %26 {strides = array<i32>} : memref<128x1xf32, #tpu.memory_space<vmem>>, vector<128x1xf32>,
    %cst_15 = arith.constant dense<0xFF800000> : vector<1xf32>
    %28 = vector.multi_reduction <maximumf>, %26, %cst_15 [0] : vector<128x1xf32> to vector<1xf32>
    %29 = vector.shape_cast %28 : vector<1xf32> to vector<1x1xf32>
    %c0_i32 = arith.constant 0 : i32
    %30 = arith.cmpi eq, %arg0, %c0_i32 : i32
    %31 = arith.extui %30 : i1 to i32
    %c0_i32_16 = arith.constant 0 : i32
    %32 = arith.cmpi ne, %31, %c0_i32_16 : i32
    scf.if %32 {
      %c0_19 = arith.constant 0 : index
      %c0_20 = arith.constant 0 : index
      %36 = vector.load %arg7[%c0_19, %c0_20] : memref<1x1xf32, #tpu.memory_space<vmem>>, vector<1x1xf32>
      tpu.vector_store %arg7[%c0_19, %c0_20], %29 {strides = array<i32>} : memref<1x1xf32, #tpu.memory_space<vmem>>, vector<1x1xf32>,
      %37 = vector.broadcast %29 : vector<1x1xf32> to vector<128x1xf32>
      %38 = arith.subf %26, %37 : vector<128x1xf32>
      %39 = math.exp %38 : vector<128x1xf32>
      %cst_21 = arith.constant dense<0.000000e+00> : vector<1xf32>
      %40 = vector.multi_reduction <add>, %39, %cst_21 [0] : vector<128x1xf32> to vector<1xf32>
      %41 = vector.shape_cast %40 : vector<1xf32> to vector<1x1xf32>
      %c0_22 = arith.constant 0 : index
      %c0_23 = arith.constant 0 : index
      %42 = vector.load %arg8[%c0_22, %c0_23] : memref<1x1xf32, #tpu.memory_space<vmem>>, vector<1x1xf32>
      tpu.vector_store %arg8[%c0_22, %c0_23], %41 {strides = array<i32>} : memref<1x1xf32, #tpu.memory_space<vmem>>, vector<1x1xf32>,
    } else {
    }
    %c0_i32_17 = arith.constant 0 : i32
    %33 = arith.cmpi sgt, %arg0, %c0_i32_17 : i32
    %34 = arith.extui %33 : i1 to i32
    %c0_i32_18 = arith.constant 0 : i32
    %35 = arith.cmpi ne, %34, %c0_i32_18 : i32
    scf.if %35 {
      %c0_19 = arith.constant 0 : index
      %c0_20 = arith.constant 0 : index
      %36 = vector.load %arg7[%c0_19, %c0_20] : memref<1x1xf32, #tpu.memory_space<vmem>>, vector<1x1xf32>
      %37 = arith.maximumf %36, %29 : vector<1x1xf32>
      %c0_21 = arith.constant 0 : index
      %c0_22 = arith.constant 0 : index
      %38 = vector.load %arg8[%c0_21, %c0_22] : memref<1x1xf32, #tpu.memory_space<vmem>>, vector<1x1xf32>
      %39 = arith.subf %36, %37 : vector<1x1xf32>
      %40 = math.exp %39 : vector<1x1xf32>
      %41 = arith.mulf %38, %40 : vector<1x1xf32>
      %42 = vector.broadcast %37 : vector<1x1xf32> to vector<128x1xf32>
      %43 = arith.subf %26, %42 : vector<128x1xf32>
      %44 = math.exp %43 : vector<128x1xf32>
      %cst_23 = arith.constant dense<0.000000e+00> : vector<1xf32>
      %45 = vector.multi_reduction <add>, %44, %cst_23 [0] : vector<128x1xf32> to vector<1xf32>
      %46 = vector.shape_cast %45 : vector<1xf32> to vector<1x1xf32>
      %47 = arith.addf %41, %46 : vector<1x1xf32>
      %c0_24 = arith.constant 0 : index
      %c0_25 = arith.constant 0 : index
      %48 = vector.load %arg8[%c0_24, %c0_25] : memref<1x1xf32, #tpu.memory_space<vmem>>, vector<1x1xf32>
      tpu.vector_store %arg8[%c0_24, %c0_25], %47 {strides = array<i32>} : memref<1x1xf32, #tpu.memory_space<vmem>>, vector<1x1xf32>,
      %c0_26 = arith.constant 0 : index
      %c0_27 = arith.constant 0 : index
      %49 = vector.load %arg7[%c0_26, %c0_27] : memref<1x1xf32, #tpu.memory_space<vmem>>, vector<1x1xf32>
      tpu.vector_store %arg7[%c0_26, %c0_27], %37 {strides = array<i32>} : memref<1x1xf32, #tpu.memory_space<vmem>>, vector<1x1xf32>,
    } else {
    }
    return
  }
  func.func @transform_0(%arg0: i32) -> (i32, i32) {
    %c0_i32 = arith.constant 0 : i32
    %c0_i32_0 = arith.constant 0 : i32
    return %arg0, %c0_i32 : i32, i32
  }
  func.func @transform_1(%arg0: i32) -> (i32, i32) {
    %c0_i32 = arith.constant 0 : i32
    %c0_i32_0 = arith.constant 0 : i32
    return %arg0, %c0_i32 : i32, i32
  }
  func.func @transform_2(%arg0: i32) -> (i32, i32) {
    %c0_i32 = arith.constant 0 : i32
    %c0_i32_0 = arith.constant 0 : i32
    return %arg0, %c0_i32 : i32, i32
  }
  func.func @transform_3(%arg0: i32) -> (i32, i32) {
    %c0_i32 = arith.constant 0 : i32
    %c0_i32_0 = arith.constant 0 : i32
    %c0_i32_1 = arith.constant 0 : i32
    return %c0_i32, %c0_i32_0 : i32, i32
  }
  func.func @transform_4(%arg0: i32) -> (i32, i32) {
    %c0_i32 = arith.constant 0 : i32
    %c0_i32_0 = arith.constant 0 : i32
    return %arg0, %c0_i32 : i32, i32
  }
  func.func @transform_5(%arg0: i32) -> (i32, i32) {
    %c0_i32 = arith.constant 0 : i32
    %c0_i32_0 = arith.constant 0 : i32
    return %arg0, %c0_i32 : i32, i32
  }
  func.func @transform_6(%arg0: i32) -> (i32, i32) {
    %c0_i32 = arith.constant 0 : i32
    %c0_i32_0 = arith.constant 0 : i32
    %c0_i32_1 = arith.constant 0 : i32
    return %c0_i32, %c0_i32_0 : i32, i32
  }
  func.func @transform_7(%arg0: i32) -> (i32, i32) {
    %c0_i32 = arith.constant 0 : i32
    %c0_i32_0 = arith.constant 0 : i32
    %c0_i32_1 = arith.constant 0 : i32
    return %c0_i32, %c0_i32_0 : i32, i32
  }
}

</mosaic_0001>

<bundles_post_ra>
// kernel: tpu_custom_call.1
= control target key start
LH: loop header
LB: loop body
LE: loop exit
PB: predicated region body
PF: predicated region fallthrough
CT: control target
= control target key end

     0   :  { %13 = vsyncpa [#allocation3], 0  ;;  %s1400_s0 = inlined_call_operand.hbm [shape: f32[128,128], index: 0, kind: input, shape index: {}]   ;;  %s1401_s1 = inlined_call_operand.hbm [shape: f32[128,128], index: 1, kind: input, shape index: {}]   ;;  %s1402_s2 = inlined_call_operand.hbm [shape: f32[128,128], index: 2, kind: input, shape index: {}]   ;;  %s1403_s3 = inlined_call_operand.vmem [shape: f32[1,128], index: 3, kind: input, shape index: {}]   ;;  %s1404_s4 = inlined_call_operand.vmem [shape: f32[128,1], index: 4, kind: output, shape index: {0}]   ;;  %s1405_s5 = inlined_call_operand.vmem [shape: f32[128,1], index: 5, kind: output, shape index: {1}]   ;;  %s1406_s6 = inlined_call_operand.hbm [shape: f32[1,1], index: 6, kind: output, shape index: {2}]   ;;  %s1407_s7 = inlined_call_operand.hbm [shape: f32[1,1], index: 7, kind: output, shape index: {3}]  }
   0x1   :  { %14 = vsyncpa [#allocation6], 0 }
   0x2   :  { %15 = vsyncpa [#allocation4], 0 }
   0x3   :  { %16 = vsyncpa [#allocation10], 0  ;;  %s34_s26 = sshll.u32 %s1401_s1, 4  ;;  %s989_s27 = smov [#allocation5]   ;;  %s35_s26 = int_to_ptr.hbm [resolvable:$true] %s34_s26 }
   0x4   :  { %s36_s28 = sshll.u32 %s989_s27, 4  ;;  %s21_s8 = sshll.u32 %s1400_s0, 4  ;;  %s37_s28 = int_to_ptr.vmem [resolvable:$true] %s36_s28  ;;  %s22_s8 = int_to_ptr.hbm [resolvable:$true] %s21_s8 }
   0x5   :  { %s990_s9 = smov 128   ;;  %s991_s10 = smov 8  }
   0x6   :  { %42 = dma.hbm_to_vmem [thread:$0]  %s35_s26, 2048, %s37_s28, [#allocation6], %s990_s9, %s990_s9, %s991_s10  }
   0x7   :  { %s992_s11 = smov [#allocation2]   ;;  %s47_s15 = sshll.u32 %s1402_s2, 4  ;;  %s48_s15 = int_to_ptr.hbm [resolvable:$true] %s47_s15 }
   0x8   :  { %s23_s12 = sshll.u32 %s992_s11, 4  ;;  %s993_s1 = smov [#allocation7]   ;;  %s24_s12 = int_to_ptr.vmem [resolvable:$true] %s23_s12 }
   0x9   :  { %29 = dma.hbm_to_vmem [thread:$0]  %s22_s8, 2048, %s24_s12, [#allocation3], %s990_s9, %s990_s9, %s991_s10  }
   0xa   :  { %s49_s16 = sshll.u32 %s993_s1, 4  ;;  %s50_s16 = int_to_ptr.vmem [resolvable:$true] %s49_s16 }
   0xb   :  { %55 = dma.hbm_to_vmem [thread:$0]  %s48_s15, 2048, %s50_s16, [#allocation6], %s990_s9, %s990_s9, %s991_s10  }
   0xc   :  { %981 = dma.done.wait [#allocation3], 2048  }
   0xd   :  { %982 = vsyncadd [#allocation3], 4294965248 }
   0xe   :  { %983 = dma.done.wait [#allocation6], 4096  }
   0xf   :  { %984 = vsyncadd [#allocation6], 4294963200  ;;  %v375_v0 = vld [vmem:[#allocation7] sm:$0xff]  ;;  %v71_v2 = vld [vmem:[#allocation2 + $0x8] sm:$0xff]  ;;  %vm358_vm0 = vcmask 7168   ;;  %vm599_vm7 = vcmask 0  }
  0x10   :  { %v824_v1 = vld [vmem:[%s1403_s3] ss:$0 sm:$0xff]  ;;  %v87_v3 = vld [vmem:[#allocation5 + $0x8] sm:$0xff]  ;;  %v73_v4 = vld [vmem:[#allocation2 + $0x18] sm:$0xff]  ;;  %v994_v32 = vmov -1e+30  }
  0x11   :  { %v395_v5 = vmul.f32 %v824_v1, %v375_v0  ;;  %v103_v6 = vsub.f32 %v71_v2, %v87_v3  ;;  %v89_v7 = vld [vmem:[#allocation5 + $0x18] sm:$0xff]  ;;  %v72_v8 = vld [vmem:[#allocation2 + $0x10] sm:$0xff]  ;;  %v70_v11 = vld [vmem:[#allocation2] sm:$0xff]  ;;  %559 = vst.msk [vmem:[%s1404_s4 + $0x8] sm:$0xff] %vm358_vm0, %v994_v32  ;;  %s785_s24 = sshll.u32 %s1406_s6, 4  ;;  %s996_s27 = smov [#allocation9]   ;;  %s786_s24 = int_to_ptr.hbm [resolvable:$true] %s785_s24 }
  0x12   :  { %v105_v9 = vsub.f32 %v73_v4, %v89_v7  ;;  %v88_v10 = vld [vmem:[#allocation5 + $0x10] sm:$0xff]  ;;  %v86_v12 = vld [vmem:[#allocation5] sm:$0xff]  ;;  %v75_v21 = vld [vmem:[#allocation2 + $0x28] sm:$0xff]  ;;  %560 = vst.msk [vmem:[%s1404_s4 + $0x10] sm:$0xff] %vm358_vm0, %v994_v32  ;;  %s794_s28 = sshll.u32 %s996_s27, 4  ;;  %s796_s8 = sshll.u32 %s1407_s7, 4  ;;  %s795_s28 = int_to_ptr.vmem [resolvable:$true] %s794_s28  ;;  %s797_s8 = int_to_ptr.hbm [resolvable:$true] %s796_s8 }
  0x13   :  { %411 = vadd.xlane.f32.xlu0 %v395_v5  ;;  %v119_v13 = vmul.f32 %v103_v6, %v103_v6  ;;  %v102_v14 = vsub.f32 %v70_v11, %v86_v12  ;;  %v74_v15 = vld [vmem:[#allocation2 + $0x20] sm:$0xff]  ;;  %v104_v18 = vsub.f32 %v72_v8, %v88_v10  ;;  %v91_v22 = vld [vmem:[#allocation5 + $0x28] sm:$0xff]  ;;  %v76_v25 = vld [vmem:[#allocation2 + $0x30] sm:$0xff]  ;;  %561 = vst.msk [vmem:[%s1404_s4 + $0x18] sm:$0xff] %vm358_vm0, %v994_v32 }
  0x14   :  { %v90_v16 = vld [vmem:[#allocation5 + $0x20] sm:$0xff]  ;;  %v121_v17 = vmul.f32 %v105_v9, %v105_v9  ;;  %v92_v26 = vld [vmem:[#allocation5 + $0x30] sm:$0xff]  ;;  %v107_v27 = vsub.f32 %v75_v21, %v91_v22  ;;  %v77_v28 = vld [vmem:[#allocation2 + $0x38] sm:$0xff]  ;;  %562 = vst.msk [vmem:[%s1404_s4 + $0x20] sm:$0xff] %vm358_vm0, %v994_v32 }
  0x15   :  { %136 = vadd.xlane.f32.xlu1 %v119_v13  ;;  %v106_v19 = vsub.f32 %v74_v15, %v90_v16  ;;  %v118_v20 = vmul.f32 %v102_v14, %v102_v14  ;;  %v120_v23 = vmul.f32 %v104_v18, %v104_v18  ;;  %v93_v29 = vld [vmem:[#allocation5 + $0x38] sm:$0xff]  ;;  %v108_v30 = vsub.f32 %v76_v25, %v92_v26  ;;  %v78_v34 = vld [vmem:[#allocation2 + $0x40] sm:$0xff]  ;;  %v79_v38 = vld [vmem:[#allocation2 + $0x48] sm:$0xff] }
  0x16   :  { %140 = vadd.xlane.f32.xlu2 %v121_v17  ;;  %v109_v31 = vsub.f32 %v77_v28, %v93_v29  ;;  %v123_v33 = vmul.f32 %v107_v27, %v107_v27  ;;  %v94_v35 = vld [vmem:[#allocation5 + $0x40] sm:$0xff]  ;;  %v95_v39 = vld [vmem:[#allocation5 + $0x48] sm:$0xff]  ;;  %563 = vst.msk [vmem:[%s1404_s4 + $0x28] sm:$0xff] %vm358_vm0, %v994_v32  ;;  %v80_v41 = vld [vmem:[#allocation2 + $0x50] sm:$0xff] }
  0x17   :  { %v122_v24 = vmul.f32 %v106_v19, %v106_v19  ;;  %v124_v36 = vmul.f32 %v108_v30, %v108_v30  ;;  %v110_v40 = vsub.f32 %v78_v34, %v94_v35  ;;  %v96_v42 = vld [vmem:[#allocation5 + $0x50] sm:$0xff]  ;;  %564 = vst.msk [vmem:[%s1404_s4 + $0x30] sm:$0xff] %vm358_vm0, %v994_v32  ;;  %v111_v43 = vsub.f32 %v79_v38, %v95_v39  ;;  %v81_v46 = vld [vmem:[#allocation2 + $0x58] sm:$0xff]  ;;  %v82_v50 = vld [vmem:[#allocation2 + $0x60] sm:$0xff] }
  0x18   :  { %v125_v37 = vmul.f32 %v109_v31, %v109_v31  ;;  %565 = vst.msk [vmem:[%s1404_s4 + $0x38] sm:$0xff] %vm358_vm0, %v994_v32  ;;  %v112_v44 = vsub.f32 %v80_v41, %v96_v42  ;;  %v97_v47 = vld [vmem:[#allocation5 + $0x58] sm:$0xff]  ;;  %v98_v51 = vld [vmem:[#allocation5 + $0x60] sm:$0xff]  ;;  %v83_v53 = vld [vmem:[#allocation2 + $0x68] sm:$0xff] }
  0x19   :  { %566 = vst.msk [vmem:[%s1404_s4 + $0x40] sm:$0xff] %vm358_vm0, %v994_v32  ;;  %v126_v45 = vmul.f32 %v110_v40, %v110_v40  ;;  %v127_v48 = vmul.f32 %v111_v43, %v111_v43  ;;  %v113_v52 = vsub.f32 %v81_v46, %v97_v47  ;;  %v99_v54 = vld [vmem:[#allocation5 + $0x68] sm:$0xff]  ;;  %v114_v55 = vsub.f32 %v82_v50, %v98_v51  ;;  %v84_v58 = vld [vmem:[#allocation2 + $0x70] sm:$0xff]  ;;  %v85_v62 = vld [vmem:[#allocation2 + $0x78] sm:$0xff] }
  0x1a   :  { %567 = vst.msk [vmem:[%s1404_s4 + $0x48] sm:$0xff] %vm358_vm0, %v994_v32  ;;  %v128_v49 = vmul.f32 %v112_v44, %v112_v44  ;;  %v115_v56 = vsub.f32 %v83_v53, %v99_v54  ;;  %v100_v59 = vld [vmem:[#allocation5 + $0x70] sm:$0xff]  ;;  %v101_v63 = vld [vmem:[#allocation5 + $0x78] sm:$0xff] }
  0x1b   :  { %134 = vadd.xlane.f32.xlu0 %v118_v20  ;;  %568 = vst.msk [vmem:[%s1404_s4 + $0x50] sm:$0xff] %vm358_vm0, %v994_v32  ;;  %v129_v57 = vmul.f32 %v113_v52, %v113_v52  ;;  %v130_v60 = vmul.f32 %v114_v55, %v114_v55  ;;  %v116_v0 = vsub.f32 %v84_v58, %v100_v59 }
  0x1c   :  { %569 = vst.msk [vmem:[%s1404_s4 + $0x58] sm:$0xff] %vm358_vm0, %v994_v32  ;;  %v131_v61 = vmul.f32 %v115_v56, %v115_v56  ;;  %v117_v1 = vsub.f32 %v85_v62, %v101_v63 }
  0x1d   :  { %138 = vadd.xlane.f32.xlu1 %v120_v23  ;;  %570 = vst.msk [vmem:[%s1404_s4 + $0x60] sm:$0xff] %vm358_vm0, %v994_v32  ;;  %v132_v2 = vmul.f32 %v116_v0, %v116_v0 }
  0x1e   :  { %142 = vadd.xlane.f32.xlu2 %v122_v24  ;;  %571 = vst.msk [vmem:[%s1404_s4 + $0x68] sm:$0xff] %vm358_vm0, %v994_v32  ;;  %v133_v3 = vmul.f32 %v117_v1, %v117_v1 }
  0x1f   :  { %572 = vst.msk [vmem:[%s1404_s4 + $0x70] sm:$0xff] %vm358_vm0, %v994_v32 }
  0x20   :  { %573 = vst.msk [vmem:[%s1404_s4 + $0x78] sm:$0xff] %vm358_vm0, %v994_v32 }
  0x23   :  { %144 = vadd.xlane.f32.xlu0 %v123_v33 }
  0x25   :  { %146 = vadd.xlane.f32.xlu1 %v124_v36 }
  0x26   :  { %148 = vadd.xlane.f32.xlu2 %v125_v37 }
  0x2b   :  { %150 = vadd.xlane.f32.xlu0 %v126_v45 }
  0x2d   :  { %152 = vadd.xlane.f32.xlu1 %v127_v48 }
  0x2e   :  { %154 = vadd.xlane.f32.xlu2 %v128_v49 }
  0x33   :  { %156 = vadd.xlane.f32.xlu0 %v129_v57 }
  0x35   :  { %158 = vadd.xlane.f32.xlu1 %v130_v60 }
  0x36   :  { %160 = vadd.xlane.f32.xlu2 %v131_v61 }
  0x3b   :  { %162 = vadd.xlane.f32.xlu0 %v132_v2 }
  0x3d   :  { %164 = vadd.xlane.f32.xlu1 %v133_v3 }
  0x86   :  { %v412_v4 = vpop.xlane.xlu0 %411 }
  0x87   :  { %vm443_vm1 = vcmp.gt.f32.partialorder %v412_v4, 0.0  ;;  %v459_v5 = vmul.f32 0.2, %v412_v4 }
  0x88   :  { %v1109_v6 = vpop.xlane.xlu1 %136 }
  0x89   :  { %v1111_v7 = vsel %vm443_vm1, %v412_v4, %v459_v5  ;;  %825 = vrsqrt.f32 %v1109_v6  ;;  %v1114_v8 = vpop.xlane.xlu2 %140  ;;  %vm185_vm2 = vcmp.eq.f32.partialorder %v1109_v6, inf  ;;  %vm187_vm3 = vcmp.eq.f32.partialorder %v1109_v6, 0.0 }
  0x8a   :  { %558 = vst.msk [vmem:[%s1404_s4] sm:$0xff] %vm358_vm0, %v1111_v7  ;;  %v574_v9 = vmax.f32 %v1111_v7, -1e+30  ;;  %827 = vrsqrt.f32 %v1114_v8  ;;  %v188_v26 = vand.u32 2147483648, %v1109_v6  ;;  %vm209_vm4 = vcmp.eq.f32.partialorder %v1114_v8, inf  ;;  %s995_s4 = smov [#allocation8]  }
  0x8b   :  { %vm211_vm5 = vcmp.eq.f32.partialorder %v1114_v8, 0.0  ;;  %v212_v30 = vand.u32 2147483648, %v1114_v8  ;;  %s1158_s21 = sshll.u32 %s995_s4, 4  ;;  %s784_s21 = int_to_ptr.vmem [resolvable:$true] %s1158_s21 }
  0x8c   :  { %v578_v10 = vmax.f32 %v574_v9, -1e+30 }
  0x8e   :  { %v582_v11 = vmax.f32 %v578_v10, -1e+30  ;;  %v1123_v12 = vpop.xlane.xlu0 %134 }
  0x8f   :  { %v826_v13 = vpop.eup %825  ;;  %829 = vrsqrt.f32 %v1123_v12  ;;  %vm173_vm6 = vcmp.eq.f32.partialorder %v1123_v12, inf  ;;  %vm175_vm8 = vcmp.eq.f32.partialorder %v1123_v12, 0.0  ;;  %v176_v42 = vand.u32 2147483648, %v1123_v12 }
  0x90   :  { %v828_v14 = vpop.eup %827  ;;  %v586_v15 = vmax.f32 %v582_v11, -1e+30  ;;  %v179_v16 = vmul.f32 %v826_v13, %v1109_v6  ;;  %v1127_v17 = vpop.xlane.xlu1 %138 }
  0x91   :  { %v203_v18 = vmul.f32 %v828_v14, %v1114_v8  ;;  %831 = vrsqrt.f32 %v1127_v17  ;;  %v1131_v19 = vpop.xlane.xlu2 %142  ;;  %vm197_vm9 = vcmp.eq.f32.partialorder %v1127_v17, inf  ;;  %v200_v50 = vand.u32 2147483648, %v1127_v17 }
  0x92   :  { %v588_v20 = vmax.f32 %v586_v15, -1e+30  ;;  %v180_v21 = vmul.f32 %v826_v13, %v179_v16  ;;  %833 = vrsqrt.f32 %v1131_v19  ;;  %vm221_vm10 = vcmp.eq.f32.partialorder %v1131_v19, inf }
  0x93   :  { %v204_v22 = vmul.f32 %v828_v14, %v203_v18  ;;  %vm223_vm11 = vcmp.eq.f32.partialorder %v1131_v19, 0.0  ;;  %v224_v11 = vand.u32 2147483648, %v1131_v19  ;;  %vm199_vm12 = vcmp.eq.f32.partialorder %v1127_v17, 0.0 }
  0x94   :  { %v589_v23 = vrot.slane %v588_v20, 4  ;;  %v181_v24 = vmul.f32 0.5, %v180_v21 }
  0x95   :  { %v830_v25 = vpop.eup %829  ;;  %v205_v27 = vmul.f32 0.5, %v204_v22 }
  0x96   :  { %v590_v28 = vmax.f32 %v588_v20, %v589_v23  ;;  %v182_v29 = vsub.f32 1.5, %v181_v24  ;;  %v167_v31 = vmul.f32 %v830_v25, %v1123_v12  ;;  %v1141_v32 = vpop.xlane.xlu0 %144 }
  0x97   :  { %v832_v33 = vpop.eup %831  ;;  %v206_v34 = vsub.f32 1.5, %v205_v27  ;;  %835 = vrsqrt.f32 %v1141_v32  ;;  %vm233_vm13 = vcmp.eq.f32.partialorder %v1141_v32, inf  ;;  %vm235_vm14 = vcmp.eq.f32.partialorder %v1141_v32, 0.0 }
  0x98   :  { %v834_v35 = vpop.eup %833  ;;  %v591_v36 = vrot.slane %v590_v28, 2  ;;  %v183_v37 = vmul.f32 %v826_v13, %v182_v29  ;;  %v191_v38 = vmul.f32 %v832_v33, %v1127_v17  ;;  %v168_v39 = vmul.f32 %v830_v25, %v167_v31  ;;  %v1147_v40 = vpop.xlane.xlu1 %146 }
  0x99   :  { %v207_v41 = vmul.f32 %v828_v14, %v206_v34  ;;  %v215_v43 = vmul.f32 %v834_v35, %v1131_v19  ;;  %837 = vrsqrt.f32 %v1147_v40  ;;  %v1153_v48 = vpop.xlane.xlu2 %148  ;;  %vm245_vm15 = vcmp.eq.f32.partialorder %v1147_v40, inf }
  0x9a   :  { %v592_v44 = vmax.f32 %v590_v28, %v591_v36  ;;  %v184_v45 = vmul.f32 %v183_v37, %v1109_v6  ;;  %v192_v46 = vmul.f32 %v832_v33, %v191_v38  ;;  %v169_v47 = vmul.f32 0.5, %v168_v39 }
  0x9b   :  { %v208_v49 = vmul.f32 %v207_v41, %v1114_v8  ;;  %v216_v51 = vmul.f32 %v834_v35, %v215_v43  ;;  %839 = vrsqrt.f32 %v1153_v48  ;;  %v236_v36 = vand.u32 2147483648, %v1141_v32 }
  0x9c   :  { %v593_v52 = vrot.slane %v592_v44, 1  ;;  %v186_v53 = vsel %vm185_vm2, %v1109_v6, %v184_v45  ;;  %v193_v54 = vmul.f32 0.5, %v192_v46  ;;  %v170_v55 = vsub.f32 1.5, %v169_v47 }
  0x9d   :  { %v836_v56 = vpop.eup %835  ;;  %v189_v57 = vsel %vm187_vm3, %v188_v26, %v186_v53  ;;  %v210_v58 = vsel %vm209_vm4, %v1114_v8, %v208_v49  ;;  %v217_v59 = vmul.f32 0.5, %v216_v51  ;;  %vm247_vm1 = vcmp.eq.f32.partialorder %v1147_v40, 0.0 }
  0x9e   :  { %v594_v60 = vmax.f32 %v592_v44, %v593_v52  ;;  %360 = vst.msk [vmem:[%s1405_s5 + $0x8] sm:$0xff] %vm358_vm0, %v189_v57  ;;  %v213_v61 = vsel %vm211_vm5, %v212_v30, %v210_v58  ;;  %v194_v62 = vsub.f32 1.5, %v193_v54  ;;  %v171_v63 = vmul.f32 %v830_v25, %v170_v55  ;;  %v1190_v9 = vpop.xlane.xlu0 %150 }
  0x9f   :  { %v838_v0 = vpop.eup %837  ;;  %362 = vst.msk [vmem:[%s1405_s5 + $0x18] sm:$0xff] %vm358_vm0, %v213_v61  ;;  %v218_v1 = vsub.f32 1.5, %v217_v59  ;;  %v227_v2 = vmul.f32 %v836_v56, %v1141_v32  ;;  %v248_v38 = vand.u32 2147483648, %v1147_v40  ;;  %vm257_vm2 = vcmp.eq.f32.partialorder %v1153_v48, inf }
  0xa0   :  { %v601_v3 = vsub.f32 %v1111_v7, %v594_v60  ;;  %v602_v4 = vsub.f32 -1e+30, %v594_v60  ;;  %v195_v5 = vmul.f32 %v832_v33, %v194_v62  ;;  %v172_v6 = vmul.f32 %v171_v63, %v1123_v12  ;;  %v1188_v8 = vpop.xlane.xlu1 %152  ;;  %600 = vst.msk [vmem:[#allocation8] sm:$0x1] %vm599_vm7, %v594_v60 }
  0xa1   :  { %v219_v10 = vmul.f32 %v834_v35, %v218_v1  ;;  %v239_v13 = vmul.f32 %v838_v0, %v1147_v40  ;;  %v228_v14 = vmul.f32 %v836_v56, %v227_v2  ;;  %788 = dma.vmem_to_hbm [thread:$0]  %s784_s21, 16, %s786_s24, [#allocation4]   ;;  %v1210_v25 = vpop.xlane.xlu2 %154  ;;  %vm259_vm3 = vcmp.eq.f32.partialorder %v1153_v48, 0.0 }
  0xa2   :  { %v617_v15 = vmul.f32 1.442695, %v601_v3  ;;  %v619_v16 = vmul.f32 1.442695, %v602_v4  ;;  %v196_v7 = vmul.f32 %v195_v5, %v1127_v17  ;;  %v174_v18 = vsel %vm173_vm6, %v1123_v12, %v172_v6  ;;  %v840_v12 = vpop.eup %839 }
  0xa3   :  { %v177_v20 = vsel %vm175_vm8, %v176_v42, %v174_v18  ;;  %v220_v21 = vmul.f32 %v219_v10, %v1131_v19  ;;  %v240_v22 = vmul.f32 %v838_v0, %v239_v13  ;;  %v229_v23 = vmul.f32 0.5, %v228_v14 }
  0xa4   :  { %841 = vpow2.f32 %v617_v15  ;;  %v198_v24 = vsel %vm197_vm9, %v1127_v17, %v196_v7  ;;  %359 = vst.msk [vmem:[%s1405_s5] sm:$0xff] %vm358_vm0, %v177_v20  ;;  %v251_v30 = vmul.f32 %v840_v12, %v1153_v48  ;;  %vm281_vm4 = vcmp.eq.f32.partialorder %v1188_v8, inf }
  0xa5   :  { %843 = vpow2.f32 %v619_v16  ;;  %v201_v26 = vsel %vm199_vm12, %v200_v50, %v198_v24  ;;  %v222_v27 = vsel %vm221_vm10, %v1131_v19, %v220_v21  ;;  %v241_v28 = vmul.f32 0.5, %v240_v22 }
  0xa6   :  { %361 = vst.msk [vmem:[%s1405_s5 + $0x10] sm:$0xff] %vm358_vm0, %v201_v26  ;;  %v225_v17 = vsel %vm223_vm11, %v224_v11, %v222_v27  ;;  %v230_v29 = vsub.f32 1.5, %v229_v23  ;;  %845 = vrsqrt.f32 %v1188_v8  ;;  %v252_v19 = vmul.f32 %v840_v12, %v251_v30  ;;  %v1238_v42 = vpop.xlane.xlu0 %156 }
  0xa7   :  { %363 = vst.msk [vmem:[%s1405_s5 + $0x20] sm:$0xff] %vm358_vm0, %v225_v17  ;;  %v242_v31 = vsub.f32 1.5, %v241_v28  ;;  %847 = vrsqrt.f32 %v1190_v9  ;;  %v260_v50 = vand.u32 2147483648, %v1153_v48  ;;  %vm269_vm5 = vcmp.eq.f32.partialorder %v1190_v9, inf }
  0xa8   :  { %v231_v33 = vmul.f32 %v836_v56, %v230_v29  ;;  %v1230_v34 = vpop.xlane.xlu1 %158  ;;  %849 = vrsqrt.f32 %v1210_v25  ;;  %v253_v41 = vmul.f32 0.5, %v252_v19  ;;  %vm283_vm6 = vcmp.eq.f32.partialorder %v1188_v8, 0.0 }
  0xa9   :  { %v243_v35 = vmul.f32 %v838_v0, %v242_v31  ;;  %851 = vrsqrt.f32 %v1230_v34  ;;  %v1266_v59 = vpop.xlane.xlu2 %160  ;;  %vm271_vm8 = vcmp.eq.f32.partialorder %v1190_v9, 0.0  ;;  %v272_v3 = vand.u32 2147483648, %v1190_v9 }
  0xaa   :  { %v842_v37 = vpop.eup %841  ;;  %v232_v39 = vmul.f32 %v231_v33, %v1141_v32  ;;  %v254_v49 = vsub.f32 1.5, %v253_v41  ;;  %853 = vrsqrt.f32 %v1238_v42  ;;  %vm293_vm9 = vcmp.eq.f32.partialorder %v1210_v25, inf }
  0xab   :  { %v1240_v43 = vpop.eup %843  ;;  %v244_v44 = vmul.f32 %v243_v35, %v1147_v40  ;;  %855 = vrsqrt.f32 %v1266_v59  ;;  %vm295_vm10 = vcmp.eq.f32.partialorder %v1210_v25, 0.0  ;;  %v296_v29 = vand.u32 2147483648, %v1210_v25 }
  0xac   :  { %v846_v45 = vpop.eup %845  ;;  %v649_v46 = vadd.f32 %v1240_v43, %v842_v37  ;;  %v234_v47 = vsel %vm233_vm13, %v1141_v32, %v232_v39  ;;  %v255_v57 = vmul.f32 %v840_v12, %v254_v49  ;;  %vm317_vm11 = vcmp.eq.f32.partialorder %v1230_v34, inf }
  0xad   :  { %v848_v51 = vpop.eup %847  ;;  %v246_v52 = vsel %vm245_vm15, %v1147_v40, %v244_v44  ;;  %v237_v53 = vsel %vm235_vm14, %v236_v36, %v234_v47  ;;  %v275_v54 = vmul.f32 %v846_v45, %v1188_v8  ;;  %v284_v40 = vand.u32 2147483648, %v1188_v8 }
  0xae   :  { %v650_v55 = vadd.f32 %v1240_v43, %v649_v46  ;;  %v249_v56 = vsel %vm247_vm1, %v248_v38, %v246_v52  ;;  %364 = vst.msk [vmem:[%s1405_s5 + $0x28] sm:$0xff] %vm358_vm0, %v237_v53  ;;  %v263_v58 = vmul.f32 %v848_v51, %v1190_v9  ;;  %v850_v32 = vpop.eup %849  ;;  %v256_v62 = vmul.f32 %v255_v57, %v1153_v48  ;;  %v1301_v27 = vpop.xlane.xlu0 %162 }
  0xaf   :  { %365 = vst.msk [vmem:[%s1405_s5 + $0x30] sm:$0xff] %vm358_vm0, %v249_v56  ;;  %v276_v60 = vmul.f32 %v846_v45, %v275_v54  ;;  %v287_v0 = vmul.f32 %v850_v32, %v1210_v25  ;;  %v852_v1 = vpop.eup %851  ;;  %vm319_vm12 = vcmp.eq.f32.partialorder %v1230_v34, 0.0  ;;  %v320_v52 = vand.u32 2147483648, %v1230_v34 }
  0xb0   :  { %v651_v61 = vadd.f32 %v1240_v43, %v650_v55  ;;  %v264_v63 = vmul.f32 %v848_v51, %v263_v58  ;;  %v258_v5 = vsel %vm257_vm2, %v1153_v48, %v256_v62  ;;  %v1286_v11 = vpop.xlane.xlu1 %164  ;;  %v854_v13 = vpop.eup %853  ;;  %v311_v16 = vmul.f32 %v852_v1, %v1230_v34 }
  0xb1   :  { %v277_v2 = vmul.f32 0.5, %v276_v60  ;;  %v288_v10 = vmul.f32 %v850_v32, %v287_v0  ;;  %v261_v14 = vsel %vm259_vm3, %v260_v50, %v258_v5  ;;  %v299_v21 = vmul.f32 %v854_v13, %v1238_v42  ;;  %v856_v28 = vpop.eup %855 }
  0xb2   :  { %v652_v4 = vadd.f32 %v1240_v43, %v651_v61  ;;  %v265_v6 = vmul.f32 0.5, %v264_v63  ;;  %366 = vst.msk [vmem:[%s1405_s5 + $0x38] sm:$0xff] %vm358_vm0, %v261_v14  ;;  %v312_v48 = vmul.f32 %v852_v1, %v311_v16  ;;  %857 = vrsqrt.f32 %v1286_v11 }
  0xb3   :  { %v278_v15 = vsub.f32 1.5, %v277_v2  ;;  %v289_v20 = vmul.f32 0.5, %v288_v10  ;;  %v300_v26 = vmul.f32 %v854_v13, %v299_v21  ;;  %v323_v38 = vmul.f32 %v856_v28, %v1266_v59 }
  0xb4   :  { %v653_v7 = vadd.f32 %v1240_v43, %v652_v4  ;;  %v266_v18 = vsub.f32 1.5, %v265_v6  ;;  %v313_v30 = vmul.f32 0.5, %v312_v48  ;;  %859 = vrsqrt.f32 %v1301_v27 }
  0xb5   :  { %v279_v22 = vmul.f32 %v846_v45, %v278_v15  ;;  %v290_v12 = vsub.f32 1.5, %v289_v20  ;;  %v301_v35 = vmul.f32 0.5, %v300_v26  ;;  %vm305_vm13 = vcmp.eq.f32.partialorder %v1238_v42, inf }
  0xb6   :  { %v654_v23 = vadd.f32 %v1240_v43, %v653_v7  ;;  %v267_v24 = vmul.f32 %v848_v51, %v266_v18  ;;  %v314_v37 = vsub.f32 1.5, %v313_v30  ;;  %v324_v51 = vmul.f32 %v856_v28, %v323_v38 }
  0xb7   :  { %v280_v17 = vmul.f32 %v279_v22, %v1188_v8  ;;  %v291_v19 = vmul.f32 %v850_v32, %v290_v12  ;;  %v302_v50 = vsub.f32 1.5, %v301_v35  ;;  %v308_v57 = vand.u32 2147483648, %v1238_v42 }
  0xb8   :  { %v655_v31 = vadd.f32 %v1240_v43, %v654_v23  ;;  %v268_v33 = vmul.f32 %v267_v24, %v1190_v9  ;;  %v858_v46 = vpop.eup %857  ;;  %v315_v49 = vmul.f32 %v852_v1, %v314_v37  ;;  %v325_v56 = vmul.f32 0.5, %v324_v51 }
  0xb9   :  { %v282_v36 = vsel %vm281_vm4, %v1188_v8, %v280_v17  ;;  %v292_v45 = vmul.f32 %v291_v19, %v1210_v25  ;;  %v347_v53 = vmul.f32 %v858_v46, %v1286_v11  ;;  %v303_v55 = vmul.f32 %v854_v13, %v302_v50 }
  0xba   :  { %v656_v39 = vadd.f32 %v1240_v43, %v655_v31  ;;  %v285_v41 = vsel %vm283_vm6, %v284_v40, %v282_v36  ;;  %v270_v44 = vsel %vm269_vm5, %v1190_v9, %v268_v33  ;;  %v316_v54 = vmul.f32 %v315_v49, %v1230_v34  ;;  %v860_v60 = vpop.eup %859 }
  0xbb   :  { %368 = vst.msk [vmem:[%s1405_s5 + $0x48] sm:$0xff] %vm358_vm0, %v285_v41  ;;  %v273_v47 = vsel %vm271_vm8, %v272_v3, %v270_v44  ;;  %v294_v8 = vsel %vm293_vm9, %v1210_v25, %v292_v45  ;;  %v348_v58 = vmul.f32 %v858_v46, %v347_v53  ;;  %v304_v40 = vmul.f32 %v303_v55, %v1238_v42 }
  0xbc   :  { %367 = vst.msk [vmem:[%s1405_s5 + $0x40] sm:$0xff] %vm358_vm0, %v273_v47  ;;  %v297_v9 = vsel %vm295_vm10, %v296_v29, %v294_v8  ;;  %v657_v32 = vadd.f32 %v1240_v43, %v656_v39  ;;  %v318_v25 = vsel %vm317_vm11, %v1230_v34, %v316_v54  ;;  %vm307_vm14 = vcmp.eq.f32.partialorder %v1238_v42, 0.0 }
  0xbd   :  { %369 = vst.msk [vmem:[%s1405_s5 + $0x50] sm:$0xff] %vm358_vm0, %v297_v9  ;;  %v326_v61 = vsub.f32 1.5, %v325_v56  ;;  %v321_v62 = vsel %vm319_vm12, %v320_v52, %v318_v25  ;;  %v349_v63 = vmul.f32 0.5, %v348_v58  ;;  %v335_v0 = vmul.f32 %v860_v60, %v1301_v27 }
  0xbe   :  { %v658_v1 = vadd.f32 %v1240_v43, %v657_v32  ;;  %371 = vst.msk [vmem:[%s1405_s5 + $0x60] sm:$0xff] %vm358_vm0, %v321_v62  ;;  %v306_v2 = vsel %vm305_vm13, %v1238_v42, %v304_v40  ;;  %vm329_vm15 = vcmp.eq.f32.partialorder %v1266_v59, inf  ;;  %v332_v4 = vand.u32 2147483648, %v1266_v59 }
  0xbf   :  { %v327_v3 = vmul.f32 %v856_v28, %v326_v61  ;;  %v309_v5 = vsel %vm307_vm14, %v308_v57, %v306_v2  ;;  %v350_v34 = vsub.f32 1.5, %v349_v63  ;;  %v336_v6 = vmul.f32 %v860_v60, %v335_v0 }
  0xc0   :  { %v659_v10 = vadd.f32 %v1240_v43, %v658_v1  ;;  %370 = vst.msk [vmem:[%s1405_s5 + $0x58] sm:$0xff] %vm358_vm0, %v309_v5  ;;  %vm331_vm1 = vcmp.eq.f32.partialorder %v1266_v59, 0.0  ;;  %vm353_vm2 = vcmp.eq.f32.partialorder %v1286_v11, inf  ;;  %v356_v7 = vand.u32 2147483648, %v1286_v11 }
  0xc1   :  { %v328_v13 = vmul.f32 %v327_v3, %v1266_v59  ;;  %v351_v42 = vmul.f32 %v858_v46, %v350_v34  ;;  %v337_v14 = vmul.f32 0.5, %v336_v6  ;;  %vm355_vm3 = vcmp.eq.f32.partialorder %v1286_v11, 0.0 }
  0xc2   :  { %v660_v15 = vadd.f32 %v1240_v43, %v659_v10  ;;  %vm341_vm4 = vcmp.eq.f32.partialorder %v1301_v27, inf  ;;  %v344_v12 = vand.u32 2147483648, %v1301_v27  ;;  %vm343_vm5 = vcmp.eq.f32.partialorder %v1301_v27, 0.0 }
  0xc3   :  { %v330_v16 = vsel %vm329_vm15, %v1266_v59, %v328_v13  ;;  %v352_v20 = vmul.f32 %v351_v42, %v1286_v11  ;;  %v338_v21 = vsub.f32 1.5, %v337_v14 }
  0xc4   :  { %v333_v18 = vsel %vm331_vm1, %v332_v4, %v330_v16  ;;  %v661_v22 = vadd.f32 %v1240_v43, %v660_v15 }
  0xc5   :  { %372 = vst.msk [vmem:[%s1405_s5 + $0x68] sm:$0xff] %vm358_vm0, %v333_v18  ;;  %v354_v48 = vsel %vm353_vm2, %v1286_v11, %v352_v20  ;;  %v339_v59 = vmul.f32 %v860_v60, %v338_v21 }
  0xc6   :  { %v662_v23 = vadd.f32 %v1240_v43, %v661_v22  ;;  %v357_v24 = vsel %vm355_vm3, %v356_v7, %v354_v48 }
  0xc7   :  { %374 = vst.msk [vmem:[%s1405_s5 + $0x78] sm:$0xff] %vm358_vm0, %v357_v24  ;;  %v340_v26 = vmul.f32 %v339_v59, %v1301_v27 }
  0xc8   :  { %v663_v28 = vadd.f32 %v1240_v43, %v662_v23 }
  0xc9   :  { %v342_v11 = vsel %vm341_vm4, %v1301_v27, %v340_v26 }
  0xca   :  { %v664_v17 = vrot.slane %v663_v28, 4  ;;  %v345_v29 = vsel %vm343_vm5, %v344_v12, %v342_v11 }
  0xcb   :  { %373 = vst.msk [vmem:[%s1405_s5 + $0x70] sm:$0xff] %vm358_vm0, %v345_v29 }
  0xcc   :  { %v665_v30 = vadd.f32 %v664_v17, %v663_v28 }
  0xce   :  { %v666_v31 = vrot.slane %v665_v30, 2 }
  0xd0   :  { %v667_v33 = vadd.f32 %v666_v31, %v665_v30 }
  0xd2   :  { %v668_v19 = vrot.slane %v667_v33, 1 }
  0xd4   :  { %v669_v43 = vadd.f32 %v668_v19, %v667_v33 }
  0xd6   :  { %670 = vst.msk [vmem:[#allocation9] sm:$0x1] %vm599_vm7, %v669_v43 }
  0xd7   :  { %799 = dma.vmem_to_hbm [thread:$0]  %s795_s28, 16, %s797_s8, [#allocation10]  }
  0xd8   :  { %985 = dma.done.wait [#allocation4], 16  }
  0xd9   :  { %986 = vsyncadd [#allocation4], 4294967280 }
  0xda   :  { %987 = dma.done.wait [#allocation10], 16  }
  0xdb   :  { %988 = vsyncadd [#allocation10], 4294967280 }
  0xdc   :  { %812 = vsyncpa [#allocation3], 1 }
  0xdd   :  { %813 = vsyncpa [#allocation6], 1 }
  0xde   :  { %814 = vsyncpa [#allocation4], 1 }
  0xdf   :  { %815 = vsyncpa [#allocation10], 1 }

</bundles_post_ra>
